<compile_context>
chip_gen: v7x
topology: tpu7x:2x2x1
jax: 0.10.0
libtpu: 0.0.40
codegen_flags: <defaults>
</compile_context>

<pallas_src>
import functools

import jax
import jax.numpy as jnp
import numpy as np
from jax.experimental import pallas as pl
from jax.experimental.pallas import tpu as pltpu


def _round_up(x, m):
    return (x + m - 1) // m * m


# --------------------------------------------------------------------------
# Parameter construction / packing
# --------------------------------------------------------------------------
def init_sponet_layers(key, num_features, depth, width):
    """Deterministic init mirroring torch.nn.Linear defaults.

    Returns a list of (W, b) with W in PyTorch (out_dim, in_dim) orientation
    and b either a (out_dim,) vector or None (final layer when depth > 0).
    """
    if depth == 0:
        dims = [(1, num_features, True)]
    else:
        dims = ([(width, num_features, True)]
                + [(width, width, True)] * (depth - 1)
                + [(1, width, False)])
    layers = []
    for dout, din, has_b in dims:
        key, kw, kb = jax.random.split(key, 3)
        bound = 1.0 / np.sqrt(din)
        w = jax.random.uniform(kw, (dout, din), jnp.float32, -bound, bound)
        b = (jax.random.uniform(kb, (dout,), jnp.float32, -bound, bound)
             if has_b else None)
        layers.append((w, b))
    return layers


def pack_sponet_params(layers):
    """Pack parameters into two buffers.

    mat_pack : bf16 (Rw, Cw)  -- all hidden-layer weight matrices, (out, in)
                                 orientation, each chunk 8-row aligned.
    col_pack : f32  (Rc, 1)   -- all biases, the final (1, width) weight stored
                                 as a length-`width` column, and (depth==0
                                 only) the final bias scalar.
    meta     : static python offsets consumed at trace time by the kernel.
    """
    mat_layers = layers[:-1]
    w_final, b_final = layers[-1]
    assert w_final.shape[0] == 1, "final SPONet layer must have out_dim == 1"

    cw = _round_up(max([w.shape[1] for w, _ in mat_layers], default=1), 128)

    mat_meta = []      # (row_off, out_dim, in_dim, bias_off)
    mat_entries = []   # (row_off, np weight)
    col_entries = []   # (col_off, np 1-D values)
    r = c = 0
    for w, b in mat_layers:
        dout, din = w.shape
        mat_meta.append((r, dout, din, c))
        mat_entries.append((r, np.asarray(w, np.float32)))
        col_entries.append((c, np.asarray(b, np.float32).reshape(-1)))
        r += _round_up(dout, 8)
        c += _round_up(dout, 8)

    fin = w_final.shape[1]
    final_w_off = c
    col_entries.append((c, np.asarray(w_final, np.float32).reshape(-1)))
    c += _round_up(fin, 8)
    final_b_off = None
    if b_final is not None:
        final_b_off = c
        col_entries.append((c, np.asarray(b_final, np.float32).reshape(-1)))
        c += 8

    rw, rc = max(r, 8), max(c, 8)
    mat_np = np.zeros((rw, cw), np.float32)
    for off, w in mat_entries:
        mat_np[off:off + w.shape[0], :w.shape[1]] = w
    col_np = np.zeros((rc, 1), np.float32)
    for off, v in col_entries:
        col_np[off:off + v.shape[0], 0] = v

    meta = {"mat_meta": tuple(mat_meta), "final": (final_w_off, fin, final_b_off)}
    return (jnp.asarray(mat_np, jnp.bfloat16),
            jnp.asarray(col_np, jnp.float32),
            meta)


# --------------------------------------------------------------------------
# Kernel
# --------------------------------------------------------------------------
def _spo_kernel(x_ref, w_ref, c_ref, o_ref, *,
                mat_meta, final, relu_sign, act_dtype):
    """Whole SPONet forward for one batch tile (batch on the lane axis)."""
    leak = 0.01

    def bias_act(y_f32, boff, dout):
        b = c_ref[boff:boff + dout, 0:1]                      # f32 (dout, 1)
        if act_dtype == jnp.float32:
            y = y_f32 + b
        else:                                                 # bf16 VALU path
            y = y_f32.astype(act_dtype) + b.astype(act_dtype)
        return jnp.maximum(y, leak * y)                       # LeakyReLU, 2 ops

    if mat_meta:
        # First hidden layer: contract over features directly from the
        # (batch_tile, features) input block -> (dout, tile).  The transpose
        # is folded into the MXU feed; no wrapper-side x.T HBM pass.
        roff, dout, din, boff = mat_meta[0]
        w = w_ref[roff:roff + dout, 0:din]                    # bf16 (dout, din)
        y = jax.lax.dot_general(
            w, x_ref[...].astype(jnp.bfloat16),
            (((1,), (1,)), ((), ())),
            preferred_element_type=jnp.float32)               # (dout, tile) f32
        h = bias_act(y, boff, dout)

        # Remaining hidden layers: bf16 MXU matmul + bias + LeakyReLU.
        for roff, dout, din, boff in mat_meta[1:]:
            w = w_ref[roff:roff + dout, 0:din]                # bf16 (dout, din)
            y = jnp.dot(w, h.astype(jnp.bfloat16),
                        preferred_element_type=jnp.float32)   # (dout, tile)
            h = bias_act(y, boff, dout)
        h = h.astype(jnp.float32)
    else:
        # depth == 0: the single layer is the final (features -> 1) projection.
        h = x_ref[...].astype(jnp.float32).T                  # (features, tile)

    # Final width -> 1 projection on VPU/XLU (mul + sublane reduce), fused
    # with the relu_sign * abs(.) epilogue; result is lane-dense (1, tile).
    foff, fin, fboff = final
    wcol = c_ref[foff:foff + fin, 0:1]                        # (fin, 1) f32
    z = jnp.sum(h * wcol, axis=0, keepdims=True)              # (1, tile) f32
    if fboff is not None:                                     # depth == 0 only
        z = z + c_ref[fboff:fboff + 1, 0:1]
    o_ref[...] = (relu_sign * jnp.abs(z)).astype(o_ref.dtype)


# --------------------------------------------------------------------------
# Wrapper
# --------------------------------------------------------------------------
def _hidden_act_dtype():
    """bf16 hidden activations on chips with a bf16 VALU (v6e / v7x)."""
    try:
        kind = jax.devices()[0].device_kind.lower()
    except Exception:
        return jnp.float32
    if ("v6" in kind) or ("v7" in kind) or ("7x" in kind):
        return jnp.bfloat16
    return jnp.float32


def spo_forward(x, mat_pack, col_pack, meta, relu_sign, *, max_batch_tile=2048):
    """SPONet forward: x (batch, num_features) -> (batch, 1)."""
    batch, num_features = x.shape
    max_batch_tile = max(128, _round_up(max_batch_tile, 128))

    if batch <= 256:
        # Small batch: single grid step, full-array blocks.
        batch_tile = batch
    else:
        # >= 2 grid steps so the "parallel" batch axis can be split across
        # v7x's two TensorCores; costs ~0.35 us/extra step on single-TC chips.
        batch_tile = min(max_batch_tile, _round_up(-(-batch // 2), 128))
    num_tiles = -(-batch // batch_tile)       # partial edge tile is fine

    act_dtype = _hidden_act_dtype()
    kernel = functools.partial(_spo_kernel,
                               mat_meta=meta["mat_meta"],
                               final=meta["final"],
                               relu_sign=float(relu_sign),
                               act_dtype=act_dtype)

    # Advisory cost estimate so XLA schedules surrounding ops sensibly.
    layer_flops = sum(2 * dout * din + 2 * dout
                      for _, dout, din, _ in meta["mat_meta"])
    layer_flops += 2 * meta["final"][1]
    cost = pl.CostEstimate(
        flops=int(batch) * int(layer_flops),
        transcendentals=0,
        bytes_accessed=int(x.size) * int(x.dtype.itemsize) + int(batch) * 4
        + int(mat_pack.size) * 2 + int(col_pack.size) * 4)

    out = pl.pallas_call(
        kernel,
        out_shape=jax.ShapeDtypeStruct((1, batch), jnp.float32),
        grid_spec=pltpu.PrefetchScalarGridSpec(
            num_scalar_prefetch=0,
            grid=(num_tiles,),
            in_specs=[
                # x stays in (batch, features) layout; no wrapper transpose/pad.
                pl.BlockSpec((batch_tile, num_features), lambda i: (i, 0)),
                # Constant-index parameter blocks: VMEM-resident, no re-DMA.
                pl.BlockSpec(mat_pack.shape, lambda i: (0, 0)),
                pl.BlockSpec(col_pack.shape, lambda i: (0, 0)),
            ],
            out_specs=pl.BlockSpec((1, batch_tile), lambda i: (0, i)),
        ),
        compiler_params=pltpu.CompilerParams(
            dimension_semantics=("parallel",),    # megacore-shardable on v7x
        ),
        cost_estimate=cost,
    )(x, mat_pack, col_pack)

    return out.reshape(batch, 1)


# --------------------------------------------------------------------------
# Pure-JAX reference (mirrors the PyTorch forward in f32)
# --------------------------------------------------------------------------
def spo_reference(x, layers, relu_sign):
    h = x.astype(jnp.float32)
    n = len(layers)
    for i, (w, b) in enumerate(layers):
        h = h @ w.T
        if b is not None:
            h = h + b
        if i < n - 1:
            h = jnp.where(h >= 0, h, 0.01 * h)
    return relu_sign * jnp.abs(h)


if __name__ == "__main__":
    num_features = 16
    depth = 3
    width = 32
    relu_sign = -1.0

    key = jax.random.PRNGKey(0)
    kx, kx2, kp = jax.random.split(key, 3)

    layers = init_sponet_layers(kp, num_features, depth, width)
    mat_pack, col_pack, meta = pack_sponet_params(layers)

    # Case 1: small batch -> single grid step, full-array blocks.
    x_small = jax.random.normal(kx, (16, num_features), jnp.float32)
    out_small = jax.block_until_ready(
        spo_forward(x_small, mat_pack, col_pack, meta, relu_sign))
    ref_small = spo_reference(x_small, layers, relu_sign)
    np.testing.assert_allclose(np.asarray(out_small), np.asarray(ref_small),
                               rtol=3e-2, atol=3e-2)

    # Case 2: larger, non-divisible batch -> multi-step grid with a partial
    # edge tile (no wrapper-side transpose or pad of x).
    x_big = jax.random.normal(kx2, (1000, num_features), jnp.float32)
    out_big = jax.block_until_ready(
        spo_forward(x_big, mat_pack, col_pack, meta, relu_sign,
                    max_batch_tile=256))
    ref_big = spo_reference(x_big, layers, relu_sign)
    np.testing.assert_allclose(np.asarray(out_big), np.asarray(ref_big),
                               rtol=3e-2, atol=3e-2)

    print("KERNEL_OK")
</pallas_src>

<mosaic_0001>
module attributes {stable_mosaic.version = 11 : i64} {
  func.func @_spo_kernel(%arg0: i32, %arg1: memref<16x16xf32, #tpu.memory_space<vmem>>, %arg2: memref<96x128xbf16, #tpu.memory_space<vmem>>, %arg3: memref<128x1xf32, #tpu.memory_space<vmem>>, %arg4: memref<1x16xf32, #tpu.memory_space<vmem>>) attributes {dimension_semantics = [#tpu.dimension_semantics<parallel>], iteration_bounds = array<i64: 1>, scalar_prefetch = 0 : i64, scratch_operands = 0 : i64, tpu.core_type = #tpu.core_type<tc>, window_params = [{transform_indices = @transform_0, window_bounds = array<i64: 16, 16>}, {pipeline_mode = #tpu.pipeline_mode<synchronous>, transform_indices = @transform_1, window_bounds = array<i64: 96, 128>}, {pipeline_mode = #tpu.pipeline_mode<synchronous>, transform_indices = @transform_2, window_bounds = array<i64: 128, 1>}, {transform_indices = @transform_3, window_bounds = array<i64: 1, 16>}]} {
    %c0 = arith.constant 0 : index
    %c0_0 = arith.constant 0 : index
    %0 = vector.load %arg2[%c0, %c0_0] : memref<96x128xbf16, #tpu.memory_space<vmem>>, vector<32x16xbf16>
    %c0_1 = arith.constant 0 : index
    %c0_2 = arith.constant 0 : index
    %1 = vector.load %arg1[%c0_1, %c0_2] : memref<16x16xf32, #tpu.memory_space<vmem>>, vector<16x16xf32>
    %2 = arith.truncf %1 : vector<16x16xf32> to vector<16x16xbf16>
    %cst = arith.constant dense<0.000000e+00> : vector<32x16xf32>
    %3 = tpu.matmul %0, %2, %cst {dimension_numbers = #tpu.dot_dimension_numbers<[1], [1], [0], [0], [0, 0, 1, 0], [], []>} : vector<32x16xbf16>, vector<16x16xbf16>, vector<32x16xf32> -> vector<32x16xf32>
    %c0_3 = arith.constant 0 : index
    %c0_4 = arith.constant 0 : index
    %4 = vector.load %arg3[%c0_3, %c0_4] : memref<128x1xf32, #tpu.memory_space<vmem>>, vector<32x1xf32>
    %5 = vector.broadcast %4 : vector<32x1xf32> to vector<32x16xf32>
    %6 = arith.addf %3, %5 : vector<32x16xf32>
    %cst_5 = arith.constant 0.00999999977 : f32
    %7 = vector.broadcast %cst_5 : f32 to vector<32x16xf32>
    %8 = arith.mulf %7, %6 : vector<32x16xf32>
    %9 = arith.maximumf %6, %8 : vector<32x16xf32>
    %c32 = arith.constant 32 : index
    %c0_6 = arith.constant 0 : index
    %10 = vector.load %arg2[%c32, %c0_6] : memref<96x128xbf16, #tpu.memory_space<vmem>>, vector<32x32xbf16>
    %11 = arith.truncf %9 : vector<32x16xf32> to vector<32x16xbf16>
    %cst_7 = arith.constant dense<0.000000e+00> : vector<32x16xf32>
    %12 = tpu.matmul %10, %11, %cst_7 {dimension_numbers = #tpu.dot_dimension_numbers<[1], [0], [0], [1], [0, 0, 1, 1], [], []>} : vector<32x32xbf16>, vector<32x16xbf16>, vector<32x16xf32> -> vector<32x16xf32>
    %c32_8 = arith.constant 32 : index
    %c0_9 = arith.constant 0 : index
    %13 = vector.load %arg3[%c32_8, %c0_9] : memref<128x1xf32, #tpu.memory_space<vmem>>, vector<32x1xf32>
    %14 = vector.broadcast %13 : vector<32x1xf32> to vector<32x16xf32>
    %15 = arith.addf %12, %14 : vector<32x16xf32>
    %cst_10 = arith.constant 0.00999999977 : f32
    %16 = vector.broadcast %cst_10 : f32 to vector<32x16xf32>
    %17 = arith.mulf %16, %15 : vector<32x16xf32>
    %18 = arith.maximumf %15, %17 : vector<32x16xf32>
    %c64 = arith.constant 64 : index
    %c0_11 = arith.constant 0 : index
    %19 = vector.load %arg2[%c64, %c0_11] : memref<96x128xbf16, #tpu.memory_space<vmem>>, vector<32x32xbf16>
    %20 = arith.truncf %18 : vector<32x16xf32> to vector<32x16xbf16>
    %cst_12 = arith.constant dense<0.000000e+00> : vector<32x16xf32>
    %21 = tpu.matmul %19, %20, %cst_12 {dimension_numbers = #tpu.dot_dimension_numbers<[1], [0], [0], [1], [0, 0, 1, 1], [], []>} : vector<32x32xbf16>, vector<32x16xbf16>, vector<32x16xf32> -> vector<32x16xf32>
    %c64_13 = arith.constant 64 : index
    %c0_14 = arith.constant 0 : index
    %22 = vector.load %arg3[%c64_13, %c0_14] : memref<128x1xf32, #tpu.memory_space<vmem>>, vector<32x1xf32>
    %23 = vector.broadcast %22 : vector<32x1xf32> to vector<32x16xf32>
    %24 = arith.addf %21, %23 : vector<32x16xf32>
    %cst_15 = arith.constant 0.00999999977 : f32
    %25 = vector.broadcast %cst_15 : f32 to vector<32x16xf32>
    %26 = arith.mulf %25, %24 : vector<32x16xf32>
    %27 = arith.maximumf %24, %26 : vector<32x16xf32>
    %c96 = arith.constant 96 : index
    %c0_16 = arith.constant 0 : index
    %28 = vector.load %arg3[%c96, %c0_16] : memref<128x1xf32, #tpu.memory_space<vmem>>, vector<32x1xf32>
    %29 = vector.broadcast %28 : vector<32x1xf32> to vector<32x16xf32>
    %30 = arith.mulf %27, %29 : vector<32x16xf32>
    %cst_17 = arith.constant dense<0.000000e+00> : vector<16xf32>
    %31 = vector.multi_reduction <add>, %30, %cst_17 [0] : vector<32x16xf32> to vector<16xf32>
    %32 = vector.shape_cast %31 : vector<16xf32> to vector<1x16xf32>
    %33 = math.absf %32 : vector<1x16xf32>
    %cst_18 = arith.constant -1.000000e+00 : f32
    %34 = vector.broadcast %cst_18 : f32 to vector<1x16xf32>
    %35 = arith.mulf %34, %33 : vector<1x16xf32>
    %c0_19 = arith.constant 0 : index
    %c0_20 = arith.constant 0 : index
    %36 = vector.load %arg4[%c0_19, %c0_20] : memref<1x16xf32, #tpu.memory_space<vmem>>, vector<1x16xf32>
    tpu.vector_store %arg4[%c0_19, %c0_20], %35 {strides = array<i32>} : memref<1x16xf32, #tpu.memory_space<vmem>>, vector<1x16xf32>,
    return
  }
  func.func @transform_0(%arg0: i32) -> (i32, i32) {
    %c0_i32 = arith.constant 0 : i32
    %c0_i32_0 = arith.constant 0 : i32
    return %arg0, %c0_i32 : i32, i32
  }
  func.func @transform_1(%arg0: i32) -> (i32, i32) {
    %c0_i32 = arith.constant 0 : i32
    %c0_i32_0 = arith.constant 0 : i32
    %c0_i32_1 = arith.constant 0 : i32
    return %c0_i32, %c0_i32_0 : i32, i32
  }
  func.func @transform_2(%arg0: i32) -> (i32, i32) {
    %c0_i32 = arith.constant 0 : i32
    %c0_i32_0 = arith.constant 0 : i32
    %c0_i32_1 = arith.constant 0 : i32
    return %c0_i32, %c0_i32_0 : i32, i32
  }
  func.func @transform_3(%arg0: i32) -> (i32, i32) {
    %c0_i32 = arith.constant 0 : i32
    %c0_i32_0 = arith.constant 0 : i32
    return %c0_i32, %arg0 : i32, i32
  }
}

</mosaic_0001>

<bundles_post_ra>
// kernel: tpu_custom_call.1
= control target key start
LH: loop header
LB: loop body
LE: loop exit
PB: predicated region body
PF: predicated region fallthrough
CT: control target
= control target key end

     0   :  { %vm57_vm0 = vcmask 130048   ;;  %v470_v4 = vmov 0   ;;  %s588_s0 = inlined_call_operand.vmem [shape: f32[16,16], index: 0, kind: input, shape index: {}]   ;;  %s589_s1 = inlined_call_operand.vmem [shape: bf16[96,128], index: 1, kind: input, shape index: {}]   ;;  %s590_s2 = inlined_call_operand.vmem [shape: f32[128,1], index: 2, kind: input, shape index: {}]   ;;  %s591_s3 = inlined_call_operand.hbm [shape: f32[1,16], index: 3, kind: output, shape index: {}]  }
   0x1   :  { %v20_v0 = vld [vmem:[%s588_s0] sm:$0xff]  ;;  %v21_v1 = vld [vmem:[%s588_s0 + $0x8] sm:$0xff]  ;;  %438 = vset.pattern.permute.xlu0 %v470_v4  ;;  %439 = vset.pattern.permute.xlu1 %v470_v4  ;;  %v25_v7 = vld [vmem:[%s590_s2 + $0x10] sm:$0xff] }
   0x2   :  { %v22_v2 = vpack.c.bf16 %v21_v1, %v20_v0  ;;  %v440_v3 = vld [vmem:[%s589_s1] sm:$0xff]   ;;  %39 = vperm.xlu1 %439, %v25_v7   ;;  %v24_v8 = vld [vmem:[%s590_s2 + $0x8] sm:$0xff]  ;;  %v26_v9 = vld [vmem:[%s590_s2 + $0x18] sm:$0xff] }
   0x3   :  { %v23_v5 = vld [vmem:[%s590_s2] sm:$0xff]  ;;  %415 = vmatprep.mubr.msk.bf16.mxu0 %vm57_vm0, %v440_v3  ;;  %v441_v10 = vld [vmem:[%s589_s1 + $0x8] sm:$0xff]  }
   0x4   :  { %435 = vmatprep.subr.msk.bf16.mxu0 %vm57_vm0, %v22_v2  ;;  %v65_v6 = vsel %vm57_vm0, %v22_v2, 0  ;;  %29 = vperm.xlu0 %438, %v23_v5   ;;  %v130_v11 = vld [vmem:[%s590_s2 + $0x20] sm:$0xff]  ;;  %v131_v12 = vld [vmem:[%s590_s2 + $0x28] sm:$0xff] }
   0x5   :  { %414 = vmatpush3.bf16.xpose.msra.mxu0 %v65_v6 }
   0x6   :  { %44 = vperm.xlu1 %439, %v26_v9  }
   0x8   :  { %34 = vperm.xlu0 %438, %v24_v8  }
   0x9   :  { %8 = vsyncpa [#allocation3], 0  ;;  %v132_v13 = vld [vmem:[%s590_s2 + $0x30] sm:$0xff]  ;;  %v133_v14 = vld [vmem:[%s590_s2 + $0x38] sm:$0xff]  ;;  %vm164_vm1 = vcmask 261120   ;;  %vm374_vm2 = vcmask 122880  }
   0xa   :  { %141 = vperm.xlu1 %439, %v131_v12   ;;  %v234_v15 = vld [vmem:[%s590_s2 + $0x40] sm:$0xff]  ;;  %v235_v16 = vld [vmem:[%s590_s2 + $0x48] sm:$0xff]  ;;  %v236_v17 = vld [vmem:[%s590_s2 + $0x50] sm:$0xff] }
   0xb   :  { %v237_v18 = vld [vmem:[%s590_s2 + $0x58] sm:$0xff]  ;;  %v331_v19 = vld [vmem:[%s590_s2 + $0x60] sm:$0xff]  ;;  %v332_v20 = vld [vmem:[%s590_s2 + $0x68] sm:$0xff] }
   0xc   :  { %416 = vmatmul.mubr.msk.bf16.vlgmr.msra.gmra.mrb[0].mxu0 %vm57_vm0, %v441_v10  ;;  %136 = vperm.xlu0 %438, %v130_v11   ;;  %v333_v21 = vld [vmem:[%s590_s2 + $0x70] sm:$0xff]  ;;  %v334_v22 = vld [vmem:[%s590_s2 + $0x78] sm:$0xff]  ;;  %v444_v47 = vld [vmem:[%s589_s1 + $0x20] sm:$0xff]  }
   0xd   :  { %v442_v23 = vld [vmem:[%s589_s1 + $0x10] sm:$0xff]   ;;  %v443_v46 = vld [vmem:[%s589_s1 + $0x18] sm:$0xff]   ;;  %431 = vmatprep.mubr.msk.bf16.mxu0 %vm164_vm1, %v444_v47  ;;  %v445_v6 = vld [vmem:[%s589_s1 + $0x28] sm:$0xff]   ;;  %s471_s1 = smov [#allocation2]  }
   0xe   :  { %151 = vperm.xlu1 %439, %v133_v14   ;;  %423 = vmatprep.mubr.msk.bf16.mxu1 %vm164_vm1, %v442_v23  ;;  %s382_s30 = sshll.u32 %s471_s1, 4  ;;  %s383_s30 = int_to_ptr.vmem [resolvable:$true] %s382_s30 }
   0xf   :  { %s446_s4 = scalar_lea.vmem %s383_s30, 16  ;;  %s450_s5 = scalar_lea.vmem %s383_s30, 32 }
  0x10   :  { %146 = vperm.xlu0 %438, %v132_v13   ;;  %p447_p0 = scmp.ne.s32.totalorder %s383_s30, %s446_s4  ;;  %p451_p1 = scmp.lt.s32.totalorder %s383_s30, %s383_s30 }
  0x11   :  { %p452_p2 = scmp.lt.s32.totalorder %s450_s5, %s446_s4 }
  0x12   :  { %245 = vperm.xlu1 %439, %v235_v16  }
  0x13   :  { %p453_p3 = por %p452_p2, %p451_p1 }
  0x14   :  { %240 = vperm.xlu0 %438, %v234_v15  }
  0x15   :  { %p454_p4 = pnand %p453_p3, %p447_p0 }
  0x16   :  { %255 = vperm.xlu1 %439, %v237_v18  }
  0x18   :  { %250 = vperm.xlu0 %438, %v236_v17  }
  0x1a   :  { %342 = vperm.xlu1 %439, %v332_v20  }
  0x1c   :  { %337 = vperm.xlu0 %438, %v331_v19  }
  0x1e   :  { %352 = vperm.xlu1 %439, %v334_v22  }
  0x20   :  { %347 = vperm.xlu0 %438, %v333_v21  }
  0x81   :  { %v40_v24 = vpop.permute.xlu1 %39 }
  0x83   :  { %v30_v25 = vpop.permute.xlu0 %29 }
  0x85   :  { %v45_v29 = vpop.permute.xlu1 %44 }
  0x87   :  { %v35_v32 = vpop.permute.xlu0 %34 }
  0x89   :  { %v142_v49 = vpop.permute.xlu1 %141 }
  0x8b   :  { %v137_v48 = vpop.permute.xlu0 %136 }
  0x8d   :  { %v152_v54 = vpop.permute.xlu1 %151 }
  0x8f   :  { %v147_v50 = vpop.permute.xlu0 %146 }
  0x91   :  { %v246_v8 = vpop.permute.xlu1 %245 }
  0x93   :  { %v241_v7 = vpop.permute.xlu0 %240 }
  0x95   :  { %v256_v10 = vpop.permute.xlu1 %255 }
  0x97   :  { %v251_v9 = vpop.permute.xlu0 %250 }
  0x99   :  { %v343_v22 = vpop.permute.xlu1 %342 }
  0x9b   :  { %v338_v16 = vpop.permute.xlu0 %337 }
  0xdf   :  { %v417_v26 = vpop.f32.mrb[0].mxu0 }
  0xe0   :  { %v110_v27 = vadd.f32 %v417_v26, %v40_v24  ;;  %v101_v28 = vpop.f32.mrb[1].mxu0 }
  0xe1   :  { %v102_v30 = vadd.f32 %v101_v28, %v30_v25  ;;  %v418_v31 = vpop.f32.mrb[2].mxu0 }
  0xe2   :  { %v118_v33 = vmul.f32 0.01, %v110_v27  ;;  %v113_v34 = vadd.f32 %v418_v31, %v45_v29  ;;  %v104_v35 = vpop.f32.mrb[3].mxu0 }
  0xe3   :  { %v116_v36 = vmul.f32 0.01, %v102_v30  ;;  %v105_v37 = vadd.f32 %v104_v35, %v35_v32 }
  0xe4   :  { %v119_v38 = vmul.f32 0.01, %v113_v34  ;;  %v122_v40 = vmax.f32 %v110_v27, %v118_v33  ;;  %v353_v33 = vpop.permute.xlu1 %352 }
  0xe5   :  { %v117_v39 = vmul.f32 0.01, %v105_v37  ;;  %v120_v42 = vmax.f32 %v102_v30, %v116_v36  ;;  %v348_v30 = vpop.permute.xlu0 %347 }
  0xe6   :  { %v123_v41 = vmax.f32 %v113_v34, %v119_v38 }
  0xe7   :  { %v121_v43 = vmax.f32 %v105_v37, %v117_v39 }
  0xe8   :  { %v129_v44 = vpack.c.bf16 %v123_v41, %v122_v40 }
  0xe9   :  { %v128_v45 = vpack.c.bf16 %v121_v43, %v120_v42 }
  0xeb   :  { %419 = vmatprep.subr.bf16.mxu1 %v128_v45 }
  0xec   :  { %420 = vmatpush3.bf16.msra.mxu1 %v128_v45 }
  0xed   :  { %421 = vmatprep.subr.bf16.mxu1 %v129_v44 }
  0xf0   :  { %422 = vmatpush3.bf16.msra.mxu1 %v129_v44 }
  0xf3   :  { %424 = vmatmul.mubr.msk.bf16.vlgmr.msra.gmra.mrb[0].mxu1 %vm164_vm1, %v443_v46 }
 0x1c6   :  { %v425_v51 = vpop.f32.mrb[0].mxu1 }
 0x1c7   :  { %v214_v52 = vadd.f32 %v425_v51, %v147_v50  ;;  %v205_v53 = vpop.f32.mrb[1].mxu1 }
 0x1c8   :  { %v206_v55 = vadd.f32 %v205_v53, %v137_v48  ;;  %v426_v56 = vpop.f32.mrb[2].mxu1 }
 0x1c9   :  { %v222_v57 = vmul.f32 0.01, %v214_v52  ;;  %v217_v58 = vadd.f32 %v426_v56, %v152_v54  ;;  %v208_v59 = vpop.f32.mrb[3].mxu1 }
 0x1ca   :  { %v220_v60 = vmul.f32 0.01, %v206_v55  ;;  %v209_v61 = vadd.f32 %v208_v59, %v142_v49 }
 0x1cb   :  { %v223_v62 = vmul.f32 0.01, %v217_v58  ;;  %v226_v0 = vmax.f32 %v214_v52, %v222_v57 }
 0x1cc   :  { %v221_v63 = vmul.f32 0.01, %v209_v61  ;;  %v224_v2 = vmax.f32 %v206_v55, %v220_v60 }
 0x1cd   :  { %v227_v1 = vmax.f32 %v217_v58, %v223_v62 }
 0x1ce   :  { %v225_v3 = vmax.f32 %v209_v61, %v221_v63 }
 0x1cf   :  { %v233_v4 = vpack.c.bf16 %v227_v1, %v226_v0 }
 0x1d0   :  { %v232_v5 = vpack.c.bf16 %v225_v3, %v224_v2 }
 0x1d2   :  { %427 = vmatprep.subr.bf16.mxu0 %v232_v5 }
 0x1d3   :  { %428 = vmatpush3.bf16.msra.mxu0 %v232_v5 }
 0x1d4   :  { %429 = vmatprep.subr.bf16.mxu0 %v233_v4 }
 0x1d7   :  { %430 = vmatpush3.bf16.msra.mxu0 %v233_v4 }
 0x1da   :  { %432 = vmatmul.mubr.msk.bf16.vlgmr.msra.gmra.mrb[4].mxu0 %vm164_vm1, %v445_v6 }
 0x2ad   :  { %v433_v11 = vpop.f32.mrb[4].mxu0 }
 0x2ae   :  { %v317_v12 = vadd.f32 %v433_v11, %v251_v9  ;;  %v308_v13 = vpop.f32.mrb[5].mxu0 }
 0x2af   :  { %v309_v14 = vadd.f32 %v308_v13, %v241_v7  ;;  %v434_v15 = vpop.f32.mrb[6].mxu0 }
 0x2b0   :  { %v325_v17 = vmul.f32 0.01, %v317_v12  ;;  %v320_v18 = vadd.f32 %v434_v15, %v256_v10  ;;  %v311_v19 = vpop.f32.mrb[7].mxu0 }
 0x2b1   :  { %v323_v20 = vmul.f32 0.01, %v309_v14  ;;  %v312_v21 = vadd.f32 %v311_v19, %v246_v8 }
 0x2b2   :  { %v326_v23 = vmul.f32 0.01, %v320_v18  ;;  %v329_v24 = vmax.f32 %v317_v12, %v325_v17 }
 0x2b3   :  { %v327_v25 = vmax.f32 %v309_v14, %v323_v20  ;;  %v324_v26 = vmul.f32 0.01, %v312_v21 }
 0x2b4   :  { %v330_v28 = vmax.f32 %v320_v18, %v326_v23  ;;  %v357_v31 = vmul.f32 %v348_v30, %v329_v24 }
 0x2b5   :  { %v355_v27 = vmul.f32 %v338_v16, %v327_v25  ;;  %v328_v29 = vmax.f32 %v312_v21, %v324_v26 }
 0x2b6   :  { %v358_v35 = vmul.f32 %v353_v33, %v330_v28  ;;  %v362_v38 = vsel %vm57_vm0, %v357_v31, 0.0 }
 0x2b7   :  { %v356_v32 = vmul.f32 %v343_v22, %v328_v29  ;;  %v359_v34 = vsel %vm57_vm0, %v355_v27, 0.0 }
 0x2b8   :  { %v364_v40 = vsel %vm57_vm0, %v358_v35, 0.0 }
 0x2b9   :  { %v360_v36 = vsel %vm57_vm0, %v356_v32, 0.0 }
 0x2ba   :  { %v361_v37 = vadd.f32 %v360_v36, %v359_v34 }
 0x2bc   :  { %v363_v39 = vadd.f32 %v362_v38, %v361_v37 }
 0x2be   :  { %v365_v41 = vadd.f32 %v364_v40, %v363_v39 }
 0x2c0   :  { %v366_v42 = vrot.slane %v365_v41, 4 }
 0x2c2   :  { %v367_v43 = vadd.f32 %v366_v42, %v365_v41 }
 0x2c4   :  { %v368_v44 = vrot.slane %v367_v43, 2 }
 0x2c6   :  { %v369_v45 = vadd.f32 %v368_v44, %v367_v43 }
 0x2c8   :  { %v370_v46 = vrot.slane %v369_v45, 1 }
 0x2ca   :  { %v371_v47 = vadd.f32 %v370_v46, %v369_v45 }
 0x2cc   :  { %v372_v48 = vand.u32 2147483647, %v371_v47 }
 0x2ce   :  { %v373_v49 = vmul.f32 -1.0, %v372_v48 }
 0x2d0   :  { %375 = vst.msk [vmem:[#allocation2] sm:$0x1] %vm374_vm2, %v373_v49 }
 0x2d1   :  { %457 = shalt.err (!%p454_p4)
}
 0x2d2   :  { %s458_s8 = scalar_lea.hbm %s591_s3, 16 }
 0x2d3   :  { %p459_p5 = scmp.ne.s32.totalorder %s591_s3, %s458_s8  ;;  %p462_p6 = scmp.lt.u32.totalorder %s458_s8, %s591_s3 }
 0x2d5   :  { %p464_p7 = pnand %p462_p6, %p459_p5 }
 0x2d7   :  { %467 = shalt.err (!%p464_p7)
}
 0x2d8   :  { %385 = dma.vmem_to_hbm [thread:$0]  %s383_s30, 16, %s591_s3, [#allocation3]  }
 0x2d9   :  { %468 = dma.done.wait [#allocation3], 16  }
 0x2da   :  { %469 = vsyncadd [#allocation3], 4294967280 }
 0x2db   :  { %389 = vsyncpa [#allocation3], 1 }

</bundles_post_ra>
